<compile_context>
chip_gen: v6e
topology: v6e:2x2x1
jax: 0.10.0
libtpu: 0.0.40
codegen_flags: <defaults>
</compile_context>

<pallas_src>
import jax
import jax.numpy as jnp
from jax import lax
from jax.experimental import pallas as pl
from jax.experimental.pallas import tpu as pltpu

LOG_STD_MAX = 2.0
LOG_STD_MIN = -20.0

_LANE = 128
_SUB = 8

# Flipped off once (and remembered) if this JAX/Mosaic build rejects
# single-buffered weight BlockSpecs.
_SINGLE_BUFFER_WEIGHTS = True


def _round_up(x, m):
    return (x + m - 1) // m * m


def _actor_kernel(x_ref,
                  w1_ref, b1_ref,
                  w2_ref, b2_ref,
                  w3_ref, b3_ref,
                  wh_ref, bh_ref,
                  out_ref):
    """One batch tile: 3x (Linear + ReLU) + fused (mean | log_std) head.

    Matmul inputs are bf16 (MXU-native); accumulation, bias, ReLU and the
    log_std clip are done in f32.
    """
    x = x_ref[...]                                       # bf16 (tile_b, d8)

    h = jnp.dot(x, w1_ref[...], preferred_element_type=jnp.float32) + b1_ref[...]
    h = jnp.maximum(h, 0.0)

    h = jnp.dot(h.astype(jnp.bfloat16), w2_ref[...],
                preferred_element_type=jnp.float32) + b2_ref[...]
    h = jnp.maximum(h, 0.0)

    h = jnp.dot(h.astype(jnp.bfloat16), w3_ref[...],
                preferred_element_type=jnp.float32) + b3_ref[...]
    h = jnp.maximum(h, 0.0)

    # Fused mean|log_std head: one MXU matmul, one wide unmasked store.
    heads = jnp.dot(h.astype(jnp.bfloat16), wh_ref[...],
                    preferred_element_type=jnp.float32) + bh_ref[...]

    a_pad = out_ref.shape[-1] // 2
    col = lax.broadcasted_iota(jnp.int32, heads.shape, 1)
    clipped = jnp.clip(heads, LOG_STD_MIN, LOG_STD_MAX)
    out_ref[...] = jnp.where(col < a_pad, heads, clipped).astype(out_ref.dtype)


def actor_forward(state, packed, *, num_actions, tile_b=None, tile_cap=512):
    """Pallas implementation of Actor.forward.

    state:  (batch, input_dim) float32
    packed: dict from pack_actor_params (bf16 weights, f32 biases, heads fused).
    Returns (mean, log_std), each (batch, num_actions) float32.

    Note: call directly (un-jitted) so the one-shot Buffered(1) fallback can
    trigger; the pallas_call itself is fully compiled either way.
    """
    global _SINGLE_BUFFER_WEIGHTS

    batch, in_dim = state.shape
    w1, b1 = packed["w1"], packed["b1"]
    w2, b2 = packed["w2"], packed["b2"]
    w3, b3 = packed["w3"], packed["b3"]
    wh, bh = packed["wh"], packed["bh"]

    d8, h_pad = w1.shape
    a2_pad = wh.shape[1]
    a_pad = a2_pad // 2

    # --- batch tiling -----------------------------------------------------
    b8 = _round_up(max(batch, 1), _SUB)
    if tile_b is None:
        # >=2 grid steps when possible (lets the "parallel" axis use both v7x
        # TensorCores), capped at tile_cap rows, 8-rounded -> minimal padding.
        n_tiles = max(2, pl.cdiv(b8, tile_cap))
        tile_b = min(_round_up(pl.cdiv(b8, n_tiles), _SUB), b8)
    else:
        tile_b = max(_SUB, _round_up(tile_b, _SUB))
    grid_n = pl.cdiv(b8, tile_b)
    b_pad = grid_n * tile_b

    # Cast the streamed activations to bf16 once (halves input DMA); pad the
    # batch dim and (at most 7 cols of) the feature dim with zeros.
    x = state.astype(jnp.bfloat16)
    if b_pad > batch or d8 > in_dim:
        x = jnp.pad(x, ((0, b_pad - batch), (0, d8 - in_dim)))

    # --- explicit VMEM budget ----------------------------------------------
    w_bytes = (w1.size + w2.size + w3.size + wh.size) * 2      # bf16, resident
    b_bytes = (b1.size + b2.size + b3.size + bh.size) * 4      # f32,  resident
    x_bytes = 2 * tile_b * d8 * 2                              # dbl-buffered in
    o_bytes = 2 * tile_b * a2_pad * 4                          # dbl-buffered out
    act_bytes = 2 * tile_b * h_pad * 4                         # live activations
    vmem_limit = int(2 * (w_bytes + b_bytes + x_bytes + o_bytes + act_bytes)) + (8 << 20)
    vmem_limit = max(32 << 20, min(64 << 20, vmem_limit))      # v7x-safe cap

    out_shape = jax.ShapeDtypeStruct((b_pad, a2_pad), jnp.float32)

    def run(single_buffer_weights):
        def const_spec(shape):
            # Weights/biases: same block every iteration -> loaded once, stay
            # resident in VMEM; single-buffer them when supported.
            if single_buffer_weights:
                return pl.BlockSpec(shape, lambda i: (0, 0),
                                    pipeline_mode=pl.Buffered(1))
            return pl.BlockSpec(shape, lambda i: (0, 0))

        return pl.pallas_call(
            _actor_kernel,
            grid=(grid_n,),
            in_specs=[
                pl.BlockSpec((tile_b, d8), lambda i: (i, 0)),
                const_spec((d8, h_pad)), const_spec((1, h_pad)),
                const_spec((h_pad, h_pad)), const_spec((1, h_pad)),
                const_spec((h_pad, h_pad)), const_spec((1, h_pad)),
                const_spec((h_pad, a2_pad)), const_spec((1, a2_pad)),
            ],
            out_specs=pl.BlockSpec((tile_b, a2_pad), lambda i: (i, 0)),
            out_shape=out_shape,
            compiler_params=pltpu.CompilerParams(
                dimension_semantics=("parallel",),
                vmem_limit_bytes=vmem_limit),
        )(x, w1, b1, w2, b2, w3, b3, wh, bh)

    if _SINGLE_BUFFER_WEIGHTS:
        try:
            heads = run(True)
        except Exception:
            # Older Mosaic builds without Buffered(1) support: fall back once.
            _SINGLE_BUFFER_WEIGHTS = False
            heads = run(False)
    else:
        heads = run(False)

    mean = heads[:batch, :num_actions]
    log_std = heads[:batch, a_pad:a_pad + num_actions]
    return mean, log_std


def init_actor_params(key, input_dim, num_actions, layer_size):
    """Deterministic, PyTorch-nn.Linear-like init (uniform(+-1/sqrt(fan_in))).

    Weights are stored already transposed to (in_features, out_features)."""
    def linear(k, fan_in, fan_out):
        kw, kb = jax.random.split(k)
        bound = 1.0 / jnp.sqrt(fan_in)
        w = jax.random.uniform(kw, (fan_in, fan_out), jnp.float32, -bound, bound)
        b = jax.random.uniform(kb, (1, fan_out), jnp.float32, -bound, bound)
        return w, b

    k1, k2, k3, km, ks = jax.random.split(key, 5)
    w1, b1 = linear(k1, input_dim, layer_size)
    w2, b2 = linear(k2, layer_size, layer_size)
    w3, b3 = linear(k3, layer_size, layer_size)
    wm, bm = linear(km, layer_size, num_actions)
    ws, bs = linear(ks, layer_size, num_actions)
    return dict(w1=w1, b1=b1, w2=w2, b2=b2, w3=w3, b3=b3,
                wm=wm, bm=bm, ws=ws, bs=bs)


def pack_actor_params(params, input_dim, layer_size, num_actions):
    """One-time host-side packing.

    * Hidden/action feature dims zero-padded to multiples of 128; the input
      feature dim only to a multiple of 8 (no 128-wide pad of the streamed
      activations needed).
    * The two head layers fused into one (h_pad, 2*a_pad) weight + bias.
    * Weights stored bf16 (MXU-native), biases kept f32.
    Zero padding is numerically inert (zero contributions, ReLU(0)=0)."""
    d8 = _round_up(input_dim, _SUB)
    h_pad = _round_up(layer_size, _LANE)
    a_pad = _round_up(num_actions, _LANE)

    def pad2(a, rows, cols, dtype):
        a = jnp.pad(a, ((0, rows - a.shape[0]), (0, cols - a.shape[1])))
        return a.astype(dtype)

    wh = jnp.concatenate([pad2(params["wm"], h_pad, a_pad, jnp.bfloat16),
                          pad2(params["ws"], h_pad, a_pad, jnp.bfloat16)], axis=1)
    bh = jnp.concatenate([pad2(params["bm"], 1, a_pad, jnp.float32),
                          pad2(params["bs"], 1, a_pad, jnp.float32)], axis=1)
    return dict(
        w1=pad2(params["w1"], d8, h_pad, jnp.bfloat16),
        b1=pad2(params["b1"], 1, h_pad, jnp.float32),
        w2=pad2(params["w2"], h_pad, h_pad, jnp.bfloat16),
        b2=pad2(params["b2"], 1, h_pad, jnp.float32),
        w3=pad2(params["w3"], h_pad, h_pad, jnp.bfloat16),
        b3=pad2(params["b3"], 1, h_pad, jnp.float32),
        wh=wh, bh=bh)


def actor_forward_ref(state, p):
    """Pure-JAX f32 reference (unpadded params) for correctness checking."""
    h = jnp.maximum(state @ p["w1"] + p["b1"], 0.0)
    h = jnp.maximum(h @ p["w2"] + p["b2"], 0.0)
    h = jnp.maximum(h @ p["w3"] + p["b3"], 0.0)
    mean = h @ p["wm"] + p["bm"]
    log_std = jnp.clip(h @ p["ws"] + p["bs"], LOG_STD_MIN, LOG_STD_MAX)
    return mean, log_std


if __name__ == "__main__":
    def run_case(key, batch, input_dim, num_actions, layer_size, tile_b=None):
        kp, kx = jax.random.split(key)
        params = init_actor_params(kp, input_dim, num_actions, layer_size)
        packed = pack_actor_params(params, input_dim, layer_size, num_actions)
        state = jax.random.normal(kx, (batch, input_dim), jnp.float32)

        mean, log_std = actor_forward(state, packed, num_actions=num_actions,
                                      tile_b=tile_b)
        jax.block_until_ready((mean, log_std))

        mean_ref, log_std_ref = actor_forward_ref(state, params)
        assert mean.shape == (batch, num_actions)
        assert log_std.shape == (batch, num_actions)
        # bf16 matmul inputs with f32 accumulation vs. a pure-f32 reference.
        assert jnp.allclose(mean, mean_ref, atol=5e-2, rtol=5e-2), \
            float(jnp.max(jnp.abs(mean - mean_ref)))
        assert jnp.allclose(log_std, log_std_ref, atol=5e-2, rtol=5e-2), \
            float(jnp.max(jnp.abs(log_std - log_std_ref)))
        assert bool(jnp.all(log_std <= LOG_STD_MAX))
        assert bool(jnp.all(log_std >= LOG_STD_MIN))

    k1, k2, k3 = jax.random.split(jax.random.PRNGKey(0), 3)
    # Small shapes consistent with Actor(input_dim, num_actions, layer_size).
    run_case(k1, batch=8, input_dim=16, num_actions=8, layer_size=32)
    # Module-default layer_size with a multi-tile batch to exercise the grid
    # (grid=(3,), resident weights, parallel batch axis).
    run_case(k2, batch=384, input_dim=16, num_actions=8, layer_size=256, tile_b=128)
    # Odd shapes: exercises 8-rounded input width, auto tile_b and last-tile pad.
    run_case(k3, batch=37, input_dim=17, num_actions=6, layer_size=64)

    print("KERNEL_OK")
</pallas_src>

<mosaic_0001>
module attributes {stable_mosaic.version = 11 : i64} {
  func.func @_actor_kernel(%arg0: i32, %arg1: memref<8x16xbf16, #tpu.memory_space<vmem>>, %arg2: memref<16x128xbf16, #tpu.memory_space<vmem>>, %arg3: memref<1x128xf32, #tpu.memory_space<vmem>>, %arg4: memref<128x128xbf16, #tpu.memory_space<vmem>>, %arg5: memref<1x128xf32, #tpu.memory_space<vmem>>, %arg6: memref<128x128xbf16, #tpu.memory_space<vmem>>, %arg7: memref<1x128xf32, #tpu.memory_space<vmem>>, %arg8: memref<128x256xbf16, #tpu.memory_space<vmem>>, %arg9: memref<1x256xf32, #tpu.memory_space<vmem>>, %arg10: memref<8x256xf32, #tpu.memory_space<vmem>>) attributes {dimension_semantics = [#tpu.dimension_semantics<parallel>], iteration_bounds = array<i64: 1>, scalar_prefetch = 0 : i64, scratch_operands = 0 : i64, tpu.core_type = #tpu.core_type<tc>, window_params = [{transform_indices = @transform_0, window_bounds = array<i64: 8, 16>}, {pipeline_mode = #tpu.pipeline_mode<synchronous>, transform_indices = @transform_1, window_bounds = array<i64: 16, 128>}, {pipeline_mode = #tpu.pipeline_mode<synchronous>, transform_indices = @transform_2, window_bounds = array<i64: 1, 128>}, {pipeline_mode = #tpu.pipeline_mode<synchronous>, transform_indices = @transform_3, window_bounds = array<i64: 128, 128>}, {pipeline_mode = #tpu.pipeline_mode<synchronous>, transform_indices = @transform_4, window_bounds = array<i64: 1, 128>}, {pipeline_mode = #tpu.pipeline_mode<synchronous>, transform_indices = @transform_5, window_bounds = array<i64: 128, 128>}, {pipeline_mode = #tpu.pipeline_mode<synchronous>, transform_indices = @transform_6, window_bounds = array<i64: 1, 128>}, {pipeline_mode = #tpu.pipeline_mode<synchronous>, transform_indices = @transform_7, window_bounds = array<i64: 128, 256>}, {pipeline_mode = #tpu.pipeline_mode<synchronous>, transform_indices = @transform_8, window_bounds = array<i64: 1, 256>}, {transform_indices = @transform_9, window_bounds = array<i64: 8, 256>}]} {
    %c0 = arith.constant 0 : index
    %c0_0 = arith.constant 0 : index
    %0 = vector.load %arg1[%c0, %c0_0] : memref<8x16xbf16, #tpu.memory_space<vmem>>, vector<8x16xbf16>
    %c0_1 = arith.constant 0 : index
    %c0_2 = arith.constant 0 : index
    %1 = vector.load %arg2[%c0_1, %c0_2] : memref<16x128xbf16, #tpu.memory_space<vmem>>, vector<16x128xbf16>
    %cst = arith.constant dense<0.000000e+00> : vector<8x128xf32>
    %2 = tpu.matmul %0, %1, %cst {dimension_numbers = #tpu.dot_dimension_numbers<[1], [0], [0], [1], [0, 0, 1, 1], [], []>} : vector<8x16xbf16>, vector<16x128xbf16>, vector<8x128xf32> -> vector<8x128xf32>
    %c0_3 = arith.constant 0 : index
    %c0_4 = arith.constant 0 : index
    %3 = vector.load %arg3[%c0_3, %c0_4] : memref<1x128xf32, #tpu.memory_space<vmem>>, vector<1x128xf32>
    %4 = vector.broadcast %3 : vector<1x128xf32> to vector<8x128xf32>
    %5 = arith.addf %2, %4 : vector<8x128xf32>
    %cst_5 = arith.constant 0.000000e+00 : f32
    %6 = vector.broadcast %cst_5 : f32 to vector<8x128xf32>
    %7 = arith.maximumf %5, %6 : vector<8x128xf32>
    %8 = arith.truncf %7 : vector<8x128xf32> to vector<8x128xbf16>
    %c0_6 = arith.constant 0 : index
    %c0_7 = arith.constant 0 : index
    %9 = vector.load %arg4[%c0_6, %c0_7] : memref<128x128xbf16, #tpu.memory_space<vmem>>, vector<128x128xbf16>
    %cst_8 = arith.constant dense<0.000000e+00> : vector<8x128xf32>
    %10 = tpu.matmul %8, %9, %cst_8 {dimension_numbers = #tpu.dot_dimension_numbers<[1], [0], [0], [1], [0, 0, 1, 1], [], []>} : vector<8x128xbf16>, vector<128x128xbf16>, vector<8x128xf32> -> vector<8x128xf32>
    %c0_9 = arith.constant 0 : index
    %c0_10 = arith.constant 0 : index
    %11 = vector.load %arg5[%c0_9, %c0_10] : memref<1x128xf32, #tpu.memory_space<vmem>>, vector<1x128xf32>
    %12 = vector.broadcast %11 : vector<1x128xf32> to vector<8x128xf32>
    %13 = arith.addf %10, %12 : vector<8x128xf32>
    %cst_11 = arith.constant 0.000000e+00 : f32
    %14 = vector.broadcast %cst_11 : f32 to vector<8x128xf32>
    %15 = arith.maximumf %13, %14 : vector<8x128xf32>
    %16 = arith.truncf %15 : vector<8x128xf32> to vector<8x128xbf16>
    %c0_12 = arith.constant 0 : index
    %c0_13 = arith.constant 0 : index
    %17 = vector.load %arg6[%c0_12, %c0_13] : memref<128x128xbf16, #tpu.memory_space<vmem>>, vector<128x128xbf16>
    %cst_14 = arith.constant dense<0.000000e+00> : vector<8x128xf32>
    %18 = tpu.matmul %16, %17, %cst_14 {dimension_numbers = #tpu.dot_dimension_numbers<[1], [0], [0], [1], [0, 0, 1, 1], [], []>} : vector<8x128xbf16>, vector<128x128xbf16>, vector<8x128xf32> -> vector<8x128xf32>
    %c0_15 = arith.constant 0 : index
    %c0_16 = arith.constant 0 : index
    %19 = vector.load %arg7[%c0_15, %c0_16] : memref<1x128xf32, #tpu.memory_space<vmem>>, vector<1x128xf32>
    %20 = vector.broadcast %19 : vector<1x128xf32> to vector<8x128xf32>
    %21 = arith.addf %18, %20 : vector<8x128xf32>
    %cst_17 = arith.constant 0.000000e+00 : f32
    %22 = vector.broadcast %cst_17 : f32 to vector<8x128xf32>
    %23 = arith.maximumf %21, %22 : vector<8x128xf32>
    %24 = arith.truncf %23 : vector<8x128xf32> to vector<8x128xbf16>
    %c0_18 = arith.constant 0 : index
    %c0_19 = arith.constant 0 : index
    %25 = vector.load %arg8[%c0_18, %c0_19] : memref<128x256xbf16, #tpu.memory_space<vmem>>, vector<128x256xbf16>
    %cst_20 = arith.constant dense<0.000000e+00> : vector<8x256xf32>
    %26 = tpu.matmul %24, %25, %cst_20 {dimension_numbers = #tpu.dot_dimension_numbers<[1], [0], [0], [1], [0, 0, 1, 1], [], []>} : vector<8x128xbf16>, vector<128x256xbf16>, vector<8x256xf32> -> vector<8x256xf32>
    %c0_21 = arith.constant 0 : index
    %c0_22 = arith.constant 0 : index
    %27 = vector.load %arg9[%c0_21, %c0_22] : memref<1x256xf32, #tpu.memory_space<vmem>>, vector<1x256xf32>
    %28 = vector.broadcast %27 : vector<1x256xf32> to vector<8x256xf32>
    %29 = arith.addf %26, %28 : vector<8x256xf32>
    %30 = tpu.iota {dimensions = array<i32: 1>} : vector<8x256xi32>
    %cst_23 = arith.constant -2.000000e+01 : f32
    %cst_24 = arith.constant 2.000000e+00 : f32
    %31 = vector.broadcast %cst_23 : f32 to vector<8x256xf32>
    %32 = arith.maximumf %31, %29 : vector<8x256xf32>
    %33 = vector.broadcast %cst_24 : f32 to vector<8x256xf32>
    %34 = arith.minimumf %33, %32 : vector<8x256xf32>
    %c128_i32 = arith.constant 128 : i32
    %35 = vector.broadcast %c128_i32 : i32 to vector<8x256xi32>
    %36 = arith.cmpi slt, %30, %35 : vector<8x256xi32>
    %37 = arith.select %36, %29, %34 : vector<8x256xi1>, vector<8x256xf32>
    %c0_25 = arith.constant 0 : index
    %c0_26 = arith.constant 0 : index
    %38 = vector.load %arg10[%c0_25, %c0_26] : memref<8x256xf32, #tpu.memory_space<vmem>>, vector<8x256xf32>
    tpu.vector_store %arg10[%c0_25, %c0_26], %37 {strides = array<i32>} : memref<8x256xf32, #tpu.memory_space<vmem>>, vector<8x256xf32>,
    return
  }
  func.func @transform_0(%arg0: i32) -> (i32, i32) {
    %c0_i32 = arith.constant 0 : i32
    %c0_i32_0 = arith.constant 0 : i32
    return %arg0, %c0_i32 : i32, i32
  }
  func.func @transform_1(%arg0: i32) -> (i32, i32) {
    %c0_i32 = arith.constant 0 : i32
    %c0_i32_0 = arith.constant 0 : i32
    %c0_i32_1 = arith.constant 0 : i32
    return %c0_i32, %c0_i32_0 : i32, i32
  }
  func.func @transform_2(%arg0: i32) -> (i32, i32) {
    %c0_i32 = arith.constant 0 : i32
    %c0_i32_0 = arith.constant 0 : i32
    %c0_i32_1 = arith.constant 0 : i32
    return %c0_i32, %c0_i32_0 : i32, i32
  }
  func.func @transform_3(%arg0: i32) -> (i32, i32) {
    %c0_i32 = arith.constant 0 : i32
    %c0_i32_0 = arith.constant 0 : i32
    %c0_i32_1 = arith.constant 0 : i32
    return %c0_i32, %c0_i32_0 : i32, i32
  }
  func.func @transform_4(%arg0: i32) -> (i32, i32) {
    %c0_i32 = arith.constant 0 : i32
    %c0_i32_0 = arith.constant 0 : i32
    %c0_i32_1 = arith.constant 0 : i32
    return %c0_i32, %c0_i32_0 : i32, i32
  }
  func.func @transform_5(%arg0: i32) -> (i32, i32) {
    %c0_i32 = arith.constant 0 : i32
    %c0_i32_0 = arith.constant 0 : i32
    %c0_i32_1 = arith.constant 0 : i32
    return %c0_i32, %c0_i32_0 : i32, i32
  }
  func.func @transform_6(%arg0: i32) -> (i32, i32) {
    %c0_i32 = arith.constant 0 : i32
    %c0_i32_0 = arith.constant 0 : i32
    %c0_i32_1 = arith.constant 0 : i32
    return %c0_i32, %c0_i32_0 : i32, i32
  }
  func.func @transform_7(%arg0: i32) -> (i32, i32) {
    %c0_i32 = arith.constant 0 : i32
    %c0_i32_0 = arith.constant 0 : i32
    %c0_i32_1 = arith.constant 0 : i32
    return %c0_i32, %c0_i32_0 : i32, i32
  }
  func.func @transform_8(%arg0: i32) -> (i32, i32) {
    %c0_i32 = arith.constant 0 : i32
    %c0_i32_0 = arith.constant 0 : i32
    %c0_i32_1 = arith.constant 0 : i32
    return %c0_i32, %c0_i32_0 : i32, i32
  }
  func.func @transform_9(%arg0: i32) -> (i32, i32) {
    %c0_i32 = arith.constant 0 : i32
    %c0_i32_0 = arith.constant 0 : i32
    return %arg0, %c0_i32 : i32, i32
  }
}

module attributes {stable_mosaic.version = 11 : i64} {
  func.func @_actor_kernel(%arg0: i32, %arg1: memref<8x16xbf16, #tpu.memory_space<vmem>>, %arg2: memref<16x128xbf16, #tpu.memory_space<vmem>>, %arg3: memref<1x128xf32, #tpu.memory_space<vmem>>, %arg4: memref<128x128xbf16, #tpu.memory_space<vmem>>, %arg5: memref<1x128xf32, #tpu.memory_space<vmem>>, %arg6: memref<128x128xbf16, #tpu.memory_space<vmem>>, %arg7: memref<1x128xf32, #tpu.memory_space<vmem>>, %arg8: memref<128x256xbf16, #tpu.memory_space<vmem>>, %arg9: memref<1x256xf32, #tpu.memory_space<vmem>>, %arg10: memref<8x256xf32, #tpu.memory_space<vmem>>) attributes {dimension_semantics = [#tpu.dimension_semantics<parallel>], iteration_bounds = array<i64: 1>, scalar_prefetch = 0 : i64, scratch_operands = 0 : i64, tpu.core_type = #tpu.core_type<tc>, window_params = [{transform_indices = @transform_0, window_bounds = array<i64: 8, 16>}, {pipeline_mode = #tpu.pipeline_mode<synchronous>, transform_indices = @transform_1, window_bounds = array<i64: 16, 128>}, {pipeline_mode = #tpu.pipeline_mode<synchronous>, transform_indices = @transform_2, window_bounds = array<i64: 1, 128>}, {pipeline_mode = #tpu.pipeline_mode<synchronous>, transform_indices = @transform_3, window_bounds = array<i64: 128, 128>}, {pipeline_mode = #tpu.pipeline_mode<synchronous>, transform_indices = @transform_4, window_bounds = array<i64: 1, 128>}, {pipeline_mode = #tpu.pipeline_mode<synchronous>, transform_indices = @transform_5, window_bounds = array<i64: 128, 128>}, {pipeline_mode = #tpu.pipeline_mode<synchronous>, transform_indices = @transform_6, window_bounds = array<i64: 1, 128>}, {pipeline_mode = #tpu.pipeline_mode<synchronous>, transform_indices = @transform_7, window_bounds = array<i64: 128, 256>}, {pipeline_mode = #tpu.pipeline_mode<synchronous>, transform_indices = @transform_8, window_bounds = array<i64: 1, 256>}, {transform_indices = @transform_9, window_bounds = array<i64: 8, 256>}]} {
    %c0 = arith.constant 0 : index
    %c0_0 = arith.constant 0 : index
    %0 = vector.load %arg1[%c0, %c0_0] : memref<8x16xbf16, #tpu.memory_space<vmem>>, vector<8x16xbf16>
    %c0_1 = arith.constant 0 : index
    %c0_2 = arith.constant 0 : index
    %1 = vector.load %arg2[%c0_1, %c0_2] : memref<16x128xbf16, #tpu.memory_space<vmem>>, vector<16x128xbf16>
    %cst = arith.constant dense<0.000000e+00> : vector<8x128xf32>
    %2 = tpu.matmul %0, %1, %cst {dimension_numbers = #tpu.dot_dimension_numbers<[1], [0], [0], [1], [0, 0, 1, 1], [], []>} : vector<8x16xbf16>, vector<16x128xbf16>, vector<8x128xf32> -> vector<8x128xf32>
    %c0_3 = arith.constant 0 : index
    %c0_4 = arith.constant 0 : index
    %3 = vector.load %arg3[%c0_3, %c0_4] : memref<1x128xf32, #tpu.memory_space<vmem>>, vector<1x128xf32>
    %4 = vector.broadcast %3 : vector<1x128xf32> to vector<8x128xf32>
    %5 = arith.addf %2, %4 : vector<8x128xf32>
    %cst_5 = arith.constant 0.000000e+00 : f32
    %6 = vector.broadcast %cst_5 : f32 to vector<8x128xf32>
    %7 = arith.maximumf %5, %6 : vector<8x128xf32>
    %8 = arith.truncf %7 : vector<8x128xf32> to vector<8x128xbf16>
    %c0_6 = arith.constant 0 : index
    %c0_7 = arith.constant 0 : index
    %9 = vector.load %arg4[%c0_6, %c0_7] : memref<128x128xbf16, #tpu.memory_space<vmem>>, vector<128x128xbf16>
    %cst_8 = arith.constant dense<0.000000e+00> : vector<8x128xf32>
    %10 = tpu.matmul %8, %9, %cst_8 {dimension_numbers = #tpu.dot_dimension_numbers<[1], [0], [0], [1], [0, 0, 1, 1], [], []>} : vector<8x128xbf16>, vector<128x128xbf16>, vector<8x128xf32> -> vector<8x128xf32>
    %c0_9 = arith.constant 0 : index
    %c0_10 = arith.constant 0 : index
    %11 = vector.load %arg5[%c0_9, %c0_10] : memref<1x128xf32, #tpu.memory_space<vmem>>, vector<1x128xf32>
    %12 = vector.broadcast %11 : vector<1x128xf32> to vector<8x128xf32>
    %13 = arith.addf %10, %12 : vector<8x128xf32>
    %cst_11 = arith.constant 0.000000e+00 : f32
    %14 = vector.broadcast %cst_11 : f32 to vector<8x128xf32>
    %15 = arith.maximumf %13, %14 : vector<8x128xf32>
    %16 = arith.truncf %15 : vector<8x128xf32> to vector<8x128xbf16>
    %c0_12 = arith.constant 0 : index
    %c0_13 = arith.constant 0 : index
    %17 = vector.load %arg6[%c0_12, %c0_13] : memref<128x128xbf16, #tpu.memory_space<vmem>>, vector<128x128xbf16>
    %cst_14 = arith.constant dense<0.000000e+00> : vector<8x128xf32>
    %18 = tpu.matmul %16, %17, %cst_14 {dimension_numbers = #tpu.dot_dimension_numbers<[1], [0], [0], [1], [0, 0, 1, 1], [], []>} : vector<8x128xbf16>, vector<128x128xbf16>, vector<8x128xf32> -> vector<8x128xf32>
    %c0_15 = arith.constant 0 : index
    %c0_16 = arith.constant 0 : index
    %19 = vector.load %arg7[%c0_15, %c0_16] : memref<1x128xf32, #tpu.memory_space<vmem>>, vector<1x128xf32>
    %20 = vector.broadcast %19 : vector<1x128xf32> to vector<8x128xf32>
    %21 = arith.addf %18, %20 : vector<8x128xf32>
    %cst_17 = arith.constant 0.000000e+00 : f32
    %22 = vector.broadcast %cst_17 : f32 to vector<8x128xf32>
    %23 = arith.maximumf %21, %22 : vector<8x128xf32>
    %24 = arith.truncf %23 : vector<8x128xf32> to vector<8x128xbf16>
    %c0_18 = arith.constant 0 : index
    %c0_19 = arith.constant 0 : index
    %25 = vector.load %arg8[%c0_18, %c0_19] : memref<128x256xbf16, #tpu.memory_space<vmem>>, vector<128x256xbf16>
    %cst_20 = arith.constant dense<0.000000e+00> : vector<8x256xf32>
    %26 = tpu.matmul %24, %25, %cst_20 {dimension_numbers = #tpu.dot_dimension_numbers<[1], [0], [0], [1], [0, 0, 1, 1], [], []>} : vector<8x128xbf16>, vector<128x256xbf16>, vector<8x256xf32> -> vector<8x256xf32>
    %c0_21 = arith.constant 0 : index
    %c0_22 = arith.constant 0 : index
    %27 = vector.load %arg9[%c0_21, %c0_22] : memref<1x256xf32, #tpu.memory_space<vmem>>, vector<1x256xf32>
    %28 = vector.broadcast %27 : vector<1x256xf32> to vector<8x256xf32>
    %29 = arith.addf %26, %28 : vector<8x256xf32>
    %30 = tpu.iota {dimensions = array<i32: 1>} : vector<8x256xi32>
    %cst_23 = arith.constant -2.000000e+01 : f32
    %cst_24 = arith.constant 2.000000e+00 : f32
    %31 = vector.broadcast %cst_23 : f32 to vector<8x256xf32>
    %32 = arith.maximumf %31, %29 : vector<8x256xf32>
    %33 = vector.broadcast %cst_24 : f32 to vector<8x256xf32>
    %34 = arith.minimumf %33, %32 : vector<8x256xf32>
    %c128_i32 = arith.constant 128 : i32
    %35 = vector.broadcast %c128_i32 : i32 to vector<8x256xi32>
    %36 = arith.cmpi slt, %30, %35 : vector<8x256xi32>
    %37 = arith.select %36, %29, %34 : vector<8x256xi1>, vector<8x256xf32>
    %c0_25 = arith.constant 0 : index
    %c0_26 = arith.constant 0 : index
    %38 = vector.load %arg10[%c0_25, %c0_26] : memref<8x256xf32, #tpu.memory_space<vmem>>, vector<8x256xf32>
    tpu.vector_store %arg10[%c0_25, %c0_26], %37 {strides = array<i32>} : memref<8x256xf32, #tpu.memory_space<vmem>>, vector<8x256xf32>,
    return
  }
  func.func @transform_0(%arg0: i32) -> (i32, i32) {
    %c0_i32 = arith.constant 0 : i32
    %c0_i32_0 = arith.constant 0 : i32
    return %arg0, %c0_i32 : i32, i32
  }
  func.func @transform_1(%arg0: i32) -> (i32, i32) {
    %c0_i32 = arith.constant 0 : i32
    %c0_i32_0 = arith.constant 0 : i32
    %c0_i32_1 = arith.constant 0 : i32
    return %c0_i32, %c0_i32_0 : i32, i32
  }
  func.func @transform_2(%arg0: i32) -> (i32, i32) {
    %c0_i32 = arith.constant 0 : i32
    %c0_i32_0 = arith.constant 0 : i32
    %c0_i32_1 = arith.constant 0 : i32
    return %c0_i32, %c0_i32_0 : i32, i32
  }
  func.func @transform_3(%arg0: i32) -> (i32, i32) {
    %c0_i32 = arith.constant 0 : i32
    %c0_i32_0 = arith.constant 0 : i32
    %c0_i32_1 = arith.constant 0 : i32
    return %c0_i32, %c0_i32_0 : i32, i32
  }
  func.func @transform_4(%arg0: i32) -> (i32, i32) {
    %c0_i32 = arith.constant 0 : i32
    %c0_i32_0 = arith.constant 0 : i32
    %c0_i32_1 = arith.constant 0 : i32
    return %c0_i32, %c0_i32_0 : i32, i32
  }
  func.func @transform_5(%arg0: i32) -> (i32, i32) {
    %c0_i32 = arith.constant 0 : i32
    %c0_i32_0 = arith.constant 0 : i32
    %c0_i32_1 = arith.constant 0 : i32
    return %c0_i32, %c0_i32_0 : i32, i32
  }
  func.func @transform_6(%arg0: i32) -> (i32, i32) {
    %c0_i32 = arith.constant 0 : i32
    %c0_i32_0 = arith.constant 0 : i32
    %c0_i32_1 = arith.constant 0 : i32
    return %c0_i32, %c0_i32_0 : i32, i32
  }
  func.func @transform_7(%arg0: i32) -> (i32, i32) {
    %c0_i32 = arith.constant 0 : i32
    %c0_i32_0 = arith.constant 0 : i32
    %c0_i32_1 = arith.constant 0 : i32
    return %c0_i32, %c0_i32_0 : i32, i32
  }
  func.func @transform_8(%arg0: i32) -> (i32, i32) {
    %c0_i32 = arith.constant 0 : i32
    %c0_i32_0 = arith.constant 0 : i32
    %c0_i32_1 = arith.constant 0 : i32
    return %c0_i32, %c0_i32_0 : i32, i32
  }
  func.func @transform_9(%arg0: i32) -> (i32, i32) {
    %c0_i32 = arith.constant 0 : i32
    %c0_i32_0 = arith.constant 0 : i32
    return %arg0, %c0_i32 : i32, i32
  }
}

</mosaic_0001>

<bundles_post_ra>
// kernel: tpu_custom_call.1
= control target key start
LH: loop header
LB: loop body
LE: loop exit
PB: predicated region body
PF: predicated region fallthrough
CT: control target
= control target key end

     0   :  { %14 = vsyncpa [#allocation3], 0  ;;  %s974_s0 = inlined_call_operand.hbm [shape: bf16[8,16], index: 0, kind: input, shape index: {}]   ;;  %s975_s1 = inlined_call_operand.hbm [shape: bf16[16,128], index: 1, kind: input, shape index: {}]   ;;  %s976_s2 = inlined_call_operand.vmem [shape: f32[1,128], index: 2, kind: input, shape index: {}]   ;;  %s977_s3 = inlined_call_operand.hbm [shape: bf16[128,128], index: 3, kind: input, shape index: {}]   ;;  %s978_s4 = inlined_call_operand.vmem [shape: f32[1,128], index: 4, kind: input, shape index: {}]   ;;  %s979_s5 = inlined_call_operand.hbm [shape: bf16[128,128], index: 5, kind: input, shape index: {}]   ;;  %s980_s6 = inlined_call_operand.vmem [shape: f32[1,128], index: 6, kind: input, shape index: {}]   ;;  %s981_s7 = inlined_call_operand.hbm [shape: bf16[128,256], index: 7, kind: input, shape index: {}]   ;;  %s982_s8 = inlined_call_operand.vmem [shape: f32[1,256], index: 8, kind: input, shape index: {}]   ;;  %s983_s9 = inlined_call_operand.hbm [shape: f32[8,256], index: 9, kind: output, shape index: {}]  }
   0x1   :  { %15 = vsyncpa [#allocation6], 0 }
   0x2   :  { %16 = vsyncpa [#allocation9], 0 }
   0x3   :  { %17 = vsyncpa [#allocation4], 0  ;;  %s852_s30 = smov [#allocation5]  }
   0x4   :  { %s33_s10 = sshll.u32 %s852_s30, 4  ;;  %s34_s10 = int_to_ptr.vmem [resolvable:$true] %s33_s10 }
   0x5   :  { %s732_s11 = scalar_lea.vmem %s34_s10, 128  ;;  %p737_p1 = scmp.lt.s32.totalorder %s34_s10, %s34_s10 }
   0x6   :  { %p733_p0 = scmp.ne.s32.totalorder %s34_s10, %s732_s11  ;;  %p738_p2 = scmp.lt.s32.totalorder %s732_s11, %s732_s11 }
   0x8   :  { %p739_p3 = por %p738_p2, %p737_p1 }
   0xa   :  { %p740_p4 = pnand %p739_p3, %p733_p0 }
   0xc   :  { %743 = shalt.err (!%p740_p4)
}
   0xd   :  { %s853_s12 = smov 64   ;;  %s854_s13 = smov 4  }
   0xe   :  { %39 = dma.hbm_to_vmem [thread:$0]  %s975_s1, 128, %s34_s10, [#allocation6], %s853_s12, %s853_s12, %s854_s13  }
   0xf   :  { %s855_s16 = smov [#allocation8]   ;;  %s856_s18 = smov [#allocation2]  }
  0x10   :  { %s61_s17 = sshll.u32 %s855_s16, 4  ;;  %s24_s19 = sshll.u32 %s856_s18, 4  ;;  %s62_s17 = int_to_ptr.vmem [resolvable:$true] %s61_s17  ;;  %s25_s19 = int_to_ptr.vmem [resolvable:$true] %s24_s19 }
  0x11   :  { %s752_s20 = scalar_lea.vmem %s62_s17, 1024  ;;  %p757_p6 = scmp.lt.s32.totalorder %s62_s17, %s62_s17 }
  0x12   :  { %p753_p5 = scmp.ne.s32.totalorder %s62_s17, %s752_s20  ;;  %p758_p7 = scmp.lt.s32.totalorder %s752_s20, %s752_s20 }
  0x14   :  { %p759_p8 = por %p758_p7, %p757_p6 }
  0x16   :  { %p760_p9 = pnand %p759_p8, %p753_p5 }
  0x18   :  { %763 = shalt.err (!%p760_p9)
}
  0x19   :  { %67 = dma.hbm_to_vmem [thread:$0]  %s979_s5, 1024, %s62_s17, [#allocation9], %s853_s12, %s853_s12, %s854_s13  }
  0x1a   :  { %s772_s1 = scalar_lea.vmem %s25_s19, 64  ;;  %p777_p11 = scmp.lt.s32.totalorder %s25_s19, %s25_s19 }
  0x1b   :  { %p773_p10 = scmp.ne.s32.totalorder %s25_s19, %s772_s1  ;;  %p778_p12 = scmp.lt.s32.totalorder %s772_s1, %s772_s1 }
  0x1d   :  { %p779_p13 = por %p778_p12, %p777_p11 }
  0x1f   :  { %p780_p0 = pnand %p779_p13, %p773_p10 }
  0x21   :  { %783 = shalt.err (!%p780_p0)
}
  0x22   :  { %27 = dma.hbm_to_vmem [thread:$0]  %s974_s0, 64, %s25_s19, [#allocation3]  }
  0x23   :  { %s857_s25 = smov [#allocation7]   ;;  %s858_s27 = smov [#allocation10]  }
  0x24   :  { %s47_s26 = sshll.u32 %s857_s25, 4  ;;  %s75_s28 = sshll.u32 %s858_s27, 4  ;;  %s48_s26 = int_to_ptr.vmem [resolvable:$true] %s47_s26  ;;  %s76_s28 = int_to_ptr.vmem [resolvable:$true] %s75_s28 }
  0x25   :  { %s792_s29 = scalar_lea.vmem %s48_s26, 1024  ;;  %p797_p2 = scmp.lt.s32.totalorder %s48_s26, %s48_s26 }
  0x26   :  { %p793_p1 = scmp.ne.s32.totalorder %s48_s26, %s792_s29  ;;  %p798_p3 = scmp.lt.s32.totalorder %s792_s29, %s792_s29 }
  0x28   :  { %p799_p4 = por %p798_p3, %p797_p2 }
  0x2a   :  { %p800_p5 = pnand %p799_p4, %p793_p1 }
  0x2c   :  { %803 = shalt.err (!%p800_p5)
}
  0x2d   :  { %53 = dma.hbm_to_vmem [thread:$0]  %s977_s3, 1024, %s48_s26, [#allocation6], %s853_s12, %s853_s12, %s854_s13  }
  0x2e   :  { %s812_s0 = scalar_lea.vmem %s76_s28, 2048  ;;  %p817_p7 = scmp.lt.s32.totalorder %s76_s28, %s76_s28 }
  0x2f   :  { %p813_p6 = scmp.ne.s32.totalorder %s76_s28, %s812_s0  ;;  %p818_p8 = scmp.lt.s32.totalorder %s812_s0, %s812_s0 }
  0x31   :  { %p819_p9 = por %p818_p8, %p817_p7 }
  0x33   :  { %p820_p10 = pnand %p819_p9, %p813_p6 }
  0x35   :  { %823 = shalt.err (!%p820_p10)
}
  0x36   :  { %s859_s10 = smov 128   ;;  %s860_s11 = smov 8  }
  0x37   :  { %81 = dma.hbm_to_vmem [thread:$0]  %s981_s7, 2048, %s76_s28, [#allocation9], %s859_s10, %s859_s10, %s860_s11  }
  0x38   :  { %844 = dma.done.wait [#allocation3], 64  }
  0x39   :  { %845 = vsyncadd [#allocation3], 4294967232 }
  0x3a   :  { %846 = dma.done.wait [#allocation6], 1152  }
  0x3b   :  { %847 = vsyncadd [#allocation6], 4294966144 }
  0x3c   :  { %848 = dma.done.wait [#allocation9], 3072  }
  0x3d   :  { %849 = vsyncadd [#allocation9], 4294964224  ;;  %v861_v0 = vmov 0.0   ;;  %vm862_vm0 = vmmov 0   ;;  %v683_v1 = vld [vmem:[#allocation5] sm:$0xff]   ;;  %vm116_vm1 = vcmask 130048   ;;  %v406_v60 = vlaneseq }
  0x3e   :  { %624 = vmatprep.subr.bf16.mxu0 %v861_v0  ;;  %626 = vmatprep.mubr.msk.bf16.mxu0 %vm862_vm0, %v861_v0  ;;  %v100_v2 = vld [vmem:[#allocation2] sm:$0xf]  ;;  %v684_v3 = vld [vmem:[#allocation7 + $0x38] sm:$0xff]   ;;  %v686_v5 = vld [vmem:[#allocation7 + $0x28] sm:$0xff]   ;;  %v863_v51 = vmov 0  }
  0x3f   :  { %630 = vmatprep.subr.bf16.mxu1 %v861_v0  ;;  %646 = vmatprep.mubr.msk.bf16.mxu1 %vm862_vm0, %v861_v0  ;;  %v685_v4 = vld [vmem:[#allocation7 + $0x30] sm:$0xff]   ;;  %v687_v6 = vld [vmem:[#allocation7 + $0x20] sm:$0xff]   ;;  %v688_v7 = vld [vmem:[#allocation7 + $0x18] sm:$0xff]   ;;  %v407_v61 = vshrl.u32 %v406_v60, 7 }
  0x40   :  { %625 = vmatpush3.bf16.msra.mxu0 %v683_v1  ;;  %631 = vmatpush3.bf16.msra.mxu1 %v684_v3  ;;  %v689_v8 = vld [vmem:[#allocation7 + $0x10] sm:$0xff]   ;;  %v690_v9 = vld [vmem:[#allocation7 + $0x8] sm:$0xff]   ;;  %v691_v10 = vld [vmem:[#allocation7] sm:$0xff]  }
  0x41   :  { %650 = vmatprep.subr.bf16.mxu0 %v861_v0  ;;  %632 = vmatprep.subr.bf16.mxu1 %v861_v0  ;;  %v692_v11 = vld [vmem:[#allocation8 + $0x38] sm:$0xff]   ;;  %v693_v12 = vld [vmem:[#allocation8 + $0x30] sm:$0xff]   ;;  %v694_v13 = vld [vmem:[#allocation8 + $0x28] sm:$0xff]   ;;  %v408_v62 = vsub.s32 0, %v407_v61 }
  0x42   :  { %v695_v14 = vld [vmem:[#allocation8 + $0x20] sm:$0xff]   ;;  %v696_v15 = vld [vmem:[#allocation8 + $0x18] sm:$0xff]   ;;  %v697_v16 = vld [vmem:[#allocation8 + $0x10] sm:$0xff]  }
  0x43   :  { %627 = vmatmul.mubr.msk.bf16.vlgmr.msra.gmra.mxu0 %vm116_vm1, %v100_v2  ;;  %v567_v17 = vld [vmem:[%s976_s2] ss:$0 sm:$0xff]  ;;  %v698_v25 = vld [vmem:[#allocation8 + $0x8] sm:$0xff]   ;;  %v699_v26 = vld [vmem:[#allocation8] sm:$0xff]  }
  0x44   :  { %666 = vmatprep.mubr.msk.bf16.mxu0 %vm862_vm0, %v861_v0  ;;  %633 = vmatpush3.bf16.msra.mxu1 %v685_v4  ;;  %v700_v27 = vld [vmem:[#allocation10 + $0x70] ss:$8 sps:$4 sm:$0xff]   ;;  %v702_v28 = vld [vmem:[#allocation10 + $0x74] ss:$8 sps:$4 sm:$0xff]   ;;  %v705_v29 = vld [vmem:[#allocation10 + $0x64] ss:$8 sps:$4 sm:$0xff]  }
  0x45   :  { %634 = vmatprep.subr.bf16.mxu1 %v861_v0  ;;  %651 = vmatpush3.bf16.msra.mxu0 %v692_v11  ;;  %v703_v30 = vld [vmem:[#allocation10 + $0x60] ss:$8 sps:$4 sm:$0xff]   ;;  %v708_v31 = vld [vmem:[#allocation10 + $0x54] ss:$8 sps:$4 sm:$0xff]   ;;  %v706_v32 = vld [vmem:[#allocation10 + $0x50] ss:$8 sps:$4 sm:$0xff]  }
  0x46   :  { %652 = vmatprep.subr.bf16.mxu0 %v861_v0  ;;  %v711_v33 = vld [vmem:[#allocation10 + $0x44] ss:$8 sps:$4 sm:$0xff]   ;;  %v709_v34 = vld [vmem:[#allocation10 + $0x40] ss:$8 sps:$4 sm:$0xff]   ;;  %v714_v35 = vld [vmem:[#allocation10 + $0x34] ss:$8 sps:$4 sm:$0xff]  }
  0x47   :  { %v712_v36 = vld [vmem:[#allocation10 + $0x30] ss:$8 sps:$4 sm:$0xff]   ;;  %v717_v37 = vld [vmem:[#allocation10 + $0x24] ss:$8 sps:$4 sm:$0xff]   ;;  %v715_v38 = vld [vmem:[#allocation10 + $0x20] ss:$8 sps:$4 sm:$0xff]  }
  0x48   :  { %635 = vmatpush3.bf16.msra.mxu1 %v686_v5  ;;  %v720_v39 = vld [vmem:[#allocation10 + $0x14] ss:$8 sps:$4 sm:$0xff]   ;;  %v718_v40 = vld [vmem:[#allocation10 + $0x10] ss:$8 sps:$4 sm:$0xff]   ;;  %v723_v49 = vld [vmem:[#allocation10 + $0x4] ss:$8 sps:$4 sm:$0xff]  }
  0x49   :  { %636 = vmatprep.subr.bf16.mxu1 %v861_v0  ;;  %653 = vmatpush3.bf16.msra.mxu0 %v693_v12  ;;  %v570_v41 = vld [vmem:[%s978_s4] ss:$0 sm:$0xff]  ;;  %v721_v50 = vld [vmem:[#allocation10] ss:$8 sps:$4 sm:$0xff]  }
  0x4a   :  { %654 = vmatprep.subr.bf16.mxu0 %v861_v0  ;;  %v579_v52 = vld [vmem:[%s980_s6] ss:$0 sm:$0xff]  ;;  %s864_s6 = smov [#allocation11]  }
  0x4b   :  { %v404_v63 = vld [vmem:[%s982_s8] sm:$0x3]  ;;  %s556_s18 = sshll.u32 %s864_s6, 4  ;;  %s557_s18 = int_to_ptr.vmem [resolvable:$true] %s556_s18 }
  0x4c   :  { %637 = vmatpush3.bf16.msra.mxu1 %v687_v6  ;;  %v409_v1 = vrot.slane %v404_v63, %v408_v62  ;;  %s824_s19 = scalar_lea.vmem %s557_s18, 256  ;;  %p829_p12 = scmp.lt.s32.totalorder %s557_s18, %s557_s18 }
  0x4d   :  { %638 = vmatprep.subr.bf16.mxu1 %v861_v0  ;;  %655 = vmatpush3.bf16.msra.mxu0 %v694_v13  ;;  %p825_p11 = scmp.ne.s32.totalorder %s557_s18, %s824_s19  ;;  %p830_p13 = scmp.lt.s32.totalorder %s824_s19, %s824_s19 }
  0x4e   :  { %656 = vmatprep.subr.bf16.mxu0 %v861_v0 }
  0x4f   :  { %p831_p0 = por %p830_p13, %p829_p12 }
  0x50   :  { %639 = vmatpush3.bf16.msra.mxu1 %v688_v7 }
  0x51   :  { %640 = vmatprep.subr.bf16.mxu1 %v861_v0  ;;  %657 = vmatpush3.bf16.msra.mxu0 %v695_v14  ;;  %p832_p1 = pnand %p831_p0, %p825_p11 }
  0x52   :  { %658 = vmatprep.subr.bf16.mxu0 %v861_v0 }
  0x54   :  { %641 = vmatpush3.bf16.msra.mxu1 %v689_v8 }
  0x55   :  { %642 = vmatprep.subr.bf16.mxu1 %v861_v0  ;;  %659 = vmatpush3.bf16.msra.mxu0 %v696_v15 }
  0x56   :  { %660 = vmatprep.subr.bf16.mxu0 %v861_v0 }
  0x58   :  { %643 = vmatpush3.bf16.msra.mxu1 %v690_v9 }
  0x59   :  { %644 = vmatprep.subr.bf16.mxu1 %v861_v0  ;;  %661 = vmatpush3.bf16.msra.mxu0 %v697_v16 }
  0x5a   :  { %662 = vmatprep.subr.bf16.mxu0 %v861_v0 }
  0x5c   :  { %645 = vmatpush3.bf16.msra.mxu1 %v691_v10 }
  0x5d   :  { %663 = vmatpush3.bf16.msra.mxu0 %v698_v25  ;;  %496 = vmatprep.subr.bf16.mxu1 %v702_v28 }
  0x5e   :  { %664 = vmatprep.subr.bf16.mxu0 %v861_v0  ;;  %v412_v0 = vsub.s32 1, %v407_v61 }
  0x60   :  { %v413_v2 = vrot.slane %v404_v63, %v412_v0 }
  0x61   :  { %665 = vmatpush3.bf16.msra.mxu0 %v699_v26 }
 0x103   :  { %v154_v18 = vpop.f32.mrf.mxu0 }
 0x104   :  { %v155_v19 = vadd.f32 %v567_v17, %v154_v18 }
 0x105   :  { %v628_v20 = vpop.f32.mrf.mxu0 }
 0x106   :  { %v160_v21 = vmax.f32 %v155_v19, 0.0 }
 0x107   :  { %v157_v22 = vpop.f32.mrf.mxu0 }
 0x108   :  { %v161_v23 = vpack.c.bf16 %v160_v21, %v160_v21 }
 0x109   :  { %v629_v24 = vpop.f32.mrf.mxu0 }
 0x10a   :  { %647 = vmatmul.mubr.bf16.vlgmr.msra.gmra.mxu1 %v161_v23 }
 0x10b   :  { %497 = vmatpush1.bf16.msra.mxu1 %v700_v27  ;;  %528 = vmatprep.mubr.bf16.mxu1 %v863_v51 }
 0x10c   :  { %498 = vmatprep.subr.bf16.mxu1 %v705_v29 }
 0x10f   :  { %499 = vmatpush1.bf16.msra.mxu1 %v703_v30 }
 0x110   :  { %500 = vmatprep.subr.bf16.mxu1 %v708_v31 }
 0x113   :  { %501 = vmatpush1.bf16.msra.mxu1 %v706_v32 }
 0x114   :  { %502 = vmatprep.subr.bf16.mxu1 %v711_v33 }
 0x117   :  { %503 = vmatpush1.bf16.msra.mxu1 %v709_v34 }
 0x118   :  { %504 = vmatprep.subr.bf16.mxu1 %v714_v35 }
 0x11b   :  { %505 = vmatpush1.bf16.msra.mxu1 %v712_v36 }
 0x11c   :  { %506 = vmatprep.subr.bf16.mxu1 %v717_v37 }
 0x11f   :  { %507 = vmatpush1.bf16.msra.mxu1 %v715_v38 }
 0x120   :  { %508 = vmatprep.subr.bf16.mxu1 %v720_v39 }
 0x123   :  { %509 = vmatpush1.bf16.msra.mxu1 %v718_v40 }
 0x124   :  { %510 = vmatprep.subr.bf16.mxu1 %v723_v49 }
 0x127   :  { %511 = vmatpush1.bf16.msra.mxu1 %v721_v50 }
 0x1ca   :  { %v267_v42 = vpop.f32.mrf.mxu1 }
 0x1cb   :  { %v268_v43 = vadd.f32 %v570_v41, %v267_v42 }
 0x1cc   :  { %v648_v44 = vpop.f32.mrf.mxu1 }
 0x1cd   :  { %v273_v45 = vmax.f32 %v268_v43, 0.0 }
 0x1ce   :  { %v270_v46 = vpop.f32.mrf.mxu1 }
 0x1cf   :  { %v274_v47 = vpack.c.bf16 %v273_v45, %v273_v45 }
 0x1d0   :  { %v649_v48 = vpop.f32.mrf.mxu1 }
 0x1d1   :  { %667 = vmatmul.mubr.bf16.vlgmr.msra.gmra.mxu0 %v274_v47 }
 0x291   :  { %v380_v53 = vpop.f32.mrf.mxu0 }
 0x292   :  { %v381_v54 = vadd.f32 %v579_v52, %v380_v53 }
 0x293   :  { %v668_v55 = vpop.f32.mrf.mxu0 }
 0x294   :  { %v386_v56 = vmax.f32 %v381_v54, 0.0 }
 0x295   :  { %v383_v57 = vpop.f32.mrf.mxu0 }
 0x296   :  { %v387_v58 = vpack.c.bf16 %v386_v56, %v386_v56 }
 0x297   :  { %v669_v59 = vpop.f32.mrf.mxu0 }
 0x298   :  { %529 = vmatmul.mubr.bf16.vlgmr.msra.gmra.mxu1 %v387_v58 }
 0x358   :  { %v530_v3 = vpop.f32.mrf.mxu1 }
 0x359   :  { %v531_v4 = vadd.f32 %v530_v3, %v409_v1 }
 0x35a   :  { %v532_v5 = vpop.f32.mrf.mxu1 }
 0x35b   :  { %548 = vst [vmem:[#allocation11] sm:$0xff] %v531_v4  ;;  %v533_v6 = vadd.f32 %v532_v5, %v413_v2 }
 0x35c   :  { %v534_v7 = vpop.f32.mrf.mxu1 }
 0x35d   :  { %v541_v8 = vmax.f32 %v533_v6, -20.0 }
 0x35e   :  { %v535_v9 = vpop.f32.mrf.mxu1 }
 0x35f   :  { %v543_v10 = vmin.f32 %v541_v8, 2.0 }
 0x361   :  { %549 = vst [vmem:[#allocation11 + $0x8] sm:$0xff] %v543_v10 }
 0x362   :  { %835 = shalt.err (!%p832_p1)
}
 0x363   :  { %559 = dma.vmem_to_hbm [thread:$0]  %s557_s18, 256, %s983_s9, [#allocation4]  }
 0x364   :  { %850 = dma.done.wait [#allocation4], 256  }
 0x365   :  { %851 = vsyncadd [#allocation4], 4294967040 }
 0x366   :  { %563 = vsyncpa [#allocation3], 1 }
 0x367   :  { %564 = vsyncpa [#allocation6], 1 }
 0x368   :  { %565 = vsyncpa [#allocation9], 1 }
 0x369   :  { %566 = vsyncpa [#allocation4], 1 }

// kernel: tpu_custom_call.1
= control target key start
LH: loop header
LB: loop body
LE: loop exit
PB: predicated region body
PF: predicated region fallthrough
CT: control target
= control target key end

     0   :  { %14 = vsyncpa [#allocation3], 0  ;;  %s974_s0 = inlined_call_operand.hbm [shape: bf16[8,16], index: 0, kind: input, shape index: {}]   ;;  %s975_s1 = inlined_call_operand.hbm [shape: bf16[16,128], index: 1, kind: input, shape index: {}]   ;;  %s976_s2 = inlined_call_operand.vmem [shape: f32[1,128], index: 2, kind: input, shape index: {}]   ;;  %s977_s3 = inlined_call_operand.hbm [shape: bf16[128,128], index: 3, kind: input, shape index: {}]   ;;  %s978_s4 = inlined_call_operand.vmem [shape: f32[1,128], index: 4, kind: input, shape index: {}]   ;;  %s979_s5 = inlined_call_operand.hbm [shape: bf16[128,128], index: 5, kind: input, shape index: {}]   ;;  %s980_s6 = inlined_call_operand.vmem [shape: f32[1,128], index: 6, kind: input, shape index: {}]   ;;  %s981_s7 = inlined_call_operand.hbm [shape: bf16[128,256], index: 7, kind: input, shape index: {}]   ;;  %s982_s8 = inlined_call_operand.vmem [shape: f32[1,256], index: 8, kind: input, shape index: {}]   ;;  %s983_s9 = inlined_call_operand.hbm [shape: f32[8,256], index: 9, kind: output, shape index: {}]  }
   0x1   :  { %15 = vsyncpa [#allocation6], 0 }
   0x2   :  { %16 = vsyncpa [#allocation9], 0 }
   0x3   :  { %17 = vsyncpa [#allocation4], 0  ;;  %s852_s30 = smov [#allocation5]  }
   0x4   :  { %s33_s10 = sshll.u32 %s852_s30, 4  ;;  %s34_s10 = int_to_ptr.vmem [resolvable:$true] %s33_s10 }
   0x5   :  { %s732_s11 = scalar_lea.vmem %s34_s10, 128  ;;  %p737_p1 = scmp.lt.s32.totalorder %s34_s10, %s34_s10 }
   0x6   :  { %p733_p0 = scmp.ne.s32.totalorder %s34_s10, %s732_s11  ;;  %p738_p2 = scmp.lt.s32.totalorder %s732_s11, %s732_s11 }
   0x8   :  { %p739_p3 = por %p738_p2, %p737_p1 }
   0xa   :  { %p740_p4 = pnand %p739_p3, %p733_p0 }
   0xc   :  { %743 = shalt.err (!%p740_p4)
}
   0xd   :  { %s853_s12 = smov 64   ;;  %s854_s13 = smov 4  }
   0xe   :  { %39 = dma.hbm_to_vmem [thread:$0]  %s975_s1, 128, %s34_s10, [#allocation6], %s853_s12, %s853_s12, %s854_s13  }
   0xf   :  { %s855_s16 = smov [#allocation8]   ;;  %s856_s18 = smov [#allocation2]  }
  0x10   :  { %s61_s17 = sshll.u32 %s855_s16, 4  ;;  %s24_s19 = sshll.u32 %s856_s18, 4  ;;  %s62_s17 = int_to_ptr.vmem [resolvable:$true] %s61_s17  ;;  %s25_s19 = int_to_ptr.vmem [resolvable:$true] %s24_s19 }
  0x11   :  { %s752_s20 = scalar_lea.vmem %s62_s17, 1024  ;;  %p757_p6 = scmp.lt.s32.totalorder %s62_s17, %s62_s17 }
  0x12   :  { %p753_p5 = scmp.ne.s32.totalorder %s62_s17, %s752_s20  ;;  %p758_p7 = scmp.lt.s32.totalorder %s752_s20, %s752_s20 }
  0x14   :  { %p759_p8 = por %p758_p7, %p757_p6 }
  0x16   :  { %p760_p9 = pnand %p759_p8, %p753_p5 }
  0x18   :  { %763 = shalt.err (!%p760_p9)
}
  0x19   :  { %67 = dma.hbm_to_vmem [thread:$0]  %s979_s5, 1024, %s62_s17, [#allocation9], %s853_s12, %s853_s12, %s854_s13  }
  0x1a   :  { %s772_s1 = scalar_lea.vmem %s25_s19, 64  ;;  %p777_p11 = scmp.lt.s32.totalorder %s25_s19, %s25_s19 }
  0x1b   :  { %p773_p10 = scmp.ne.s32.totalorder %s25_s19, %s772_s1  ;;  %p778_p12 = scmp.lt.s32.totalorder %s772_s1, %s772_s1 }
  0x1d   :  { %p779_p13 = por %p778_p12, %p777_p11 }
  0x1f   :  { %p780_p0 = pnand %p779_p13, %p773_p10 }
  0x21   :  { %783 = shalt.err (!%p780_p0)
}
  0x22   :  { %27 = dma.hbm_to_vmem [thread:$0]  %s974_s0, 64, %s25_s19, [#allocation3]  }
  0x23   :  { %s857_s25 = smov [#allocation7]   ;;  %s858_s27 = smov [#allocation10]  }
  0x24   :  { %s47_s26 = sshll.u32 %s857_s25, 4  ;;  %s75_s28 = sshll.u32 %s858_s27, 4  ;;  %s48_s26 = int_to_ptr.vmem [resolvable:$true] %s47_s26  ;;  %s76_s28 = int_to_ptr.vmem [resolvable:$true] %s75_s28 }
  0x25   :  { %s792_s29 = scalar_lea.vmem %s48_s26, 1024  ;;  %p797_p2 = scmp.lt.s32.totalorder %s48_s26, %s48_s26 }
  0x26   :  { %p793_p1 = scmp.ne.s32.totalorder %s48_s26, %s792_s29  ;;  %p798_p3 = scmp.lt.s32.totalorder %s792_s29, %s792_s29 }
  0x28   :  { %p799_p4 = por %p798_p3, %p797_p2 }
  0x2a   :  { %p800_p5 = pnand %p799_p4, %p793_p1 }
  0x2c   :  { %803 = shalt.err (!%p800_p5)
}
  0x2d   :  { %53 = dma.hbm_to_vmem [thread:$0]  %s977_s3, 1024, %s48_s26, [#allocation6], %s853_s12, %s853_s12, %s854_s13  }
  0x2e   :  { %s812_s0 = scalar_lea.vmem %s76_s28, 2048  ;;  %p817_p7 = scmp.lt.s32.totalorder %s76_s28, %s76_s28 }
  0x2f   :  { %p813_p6 = scmp.ne.s32.totalorder %s76_s28, %s812_s0  ;;  %p818_p8 = scmp.lt.s32.totalorder %s812_s0, %s812_s0 }
  0x31   :  { %p819_p9 = por %p818_p8, %p817_p7 }
  0x33   :  { %p820_p10 = pnand %p819_p9, %p813_p6 }
  0x35   :  { %823 = shalt.err (!%p820_p10)
}
  0x36   :  { %s859_s10 = smov 128   ;;  %s860_s11 = smov 8  }
  0x37   :  { %81 = dma.hbm_to_vmem [thread:$0]  %s981_s7, 2048, %s76_s28, [#allocation9], %s859_s10, %s859_s10, %s860_s11  }
  0x38   :  { %844 = dma.done.wait [#allocation3], 64  }
  0x39   :  { %845 = vsyncadd [#allocation3], 4294967232 }
  0x3a   :  { %846 = dma.done.wait [#allocation6], 1152  }
  0x3b   :  { %847 = vsyncadd [#allocation6], 4294966144 }
  0x3c   :  { %848 = dma.done.wait [#allocation9], 3072  }
  0x3d   :  { %849 = vsyncadd [#allocation9], 4294964224  ;;  %v861_v0 = vmov 0.0   ;;  %vm862_vm0 = vmmov 0   ;;  %v683_v1 = vld [vmem:[#allocation5] sm:$0xff]   ;;  %vm116_vm1 = vcmask 130048   ;;  %v406_v60 = vlaneseq }
  0x3e   :  { %624 = vmatprep.subr.bf16.mxu0 %v861_v0  ;;  %626 = vmatprep.mubr.msk.bf16.mxu0 %vm862_vm0, %v861_v0  ;;  %v100_v2 = vld [vmem:[#allocation2] sm:$0xf]  ;;  %v684_v3 = vld [vmem:[#allocation7 + $0x38] sm:$0xff]   ;;  %v686_v5 = vld [vmem:[#allocation7 + $0x28] sm:$0xff]   ;;  %v863_v51 = vmov 0  }
  0x3f   :  { %630 = vmatprep.subr.bf16.mxu1 %v861_v0  ;;  %646 = vmatprep.mubr.msk.bf16.mxu1 %vm862_vm0, %v861_v0  ;;  %v685_v4 = vld [vmem:[#allocation7 + $0x30] sm:$0xff]   ;;  %v687_v6 = vld [vmem:[#allocation7 + $0x20] sm:$0xff]   ;;  %v688_v7 = vld [vmem:[#allocation7 + $0x18] sm:$0xff]   ;;  %v407_v61 = vshrl.u32 %v406_v60, 7 }
  0x40   :  { %625 = vmatpush3.bf16.msra.mxu0 %v683_v1  ;;  %631 = vmatpush3.bf16.msra.mxu1 %v684_v3  ;;  %v689_v8 = vld [vmem:[#allocation7 + $0x10] sm:$0xff]   ;;  %v690_v9 = vld [vmem:[#allocation7 + $0x8] sm:$0xff]   ;;  %v691_v10 = vld [vmem:[#allocation7] sm:$0xff]  }
  0x41   :  { %650 = vmatprep.subr.bf16.mxu0 %v861_v0  ;;  %632 = vmatprep.subr.bf16.mxu1 %v861_v0  ;;  %v692_v11 = vld [vmem:[#allocation8 + $0x38] sm:$0xff]   ;;  %v693_v12 = vld [vmem:[#allocation8 + $0x30] sm:$0xff]   ;;  %v694_v13 = vld [vmem:[#allocation8 + $0x28] sm:$0xff]   ;;  %v408_v62 = vsub.s32 0, %v407_v61 }
  0x42   :  { %v695_v14 = vld [vmem:[#allocation8 + $0x20] sm:$0xff]   ;;  %v696_v15 = vld [vmem:[#allocation8 + $0x18] sm:$0xff]   ;;  %v697_v16 = vld [vmem:[#allocation8 + $0x10] sm:$0xff]  }
  0x43   :  { %627 = vmatmul.mubr.msk.bf16.vlgmr.msra.gmra.mxu0 %vm116_vm1, %v100_v2  ;;  %v567_v17 = vld [vmem:[%s976_s2] ss:$0 sm:$0xff]  ;;  %v698_v25 = vld [vmem:[#allocation8 + $0x8] sm:$0xff]   ;;  %v699_v26 = vld [vmem:[#allocation8] sm:$0xff]  }
  0x44   :  { %666 = vmatprep.mubr.msk.bf16.mxu0 %vm862_vm0, %v861_v0  ;;  %633 = vmatpush3.bf16.msra.mxu1 %v685_v4  ;;  %v700_v27 = vld [vmem:[#allocation10 + $0x70] ss:$8 sps:$4 sm:$0xff]   ;;  %v702_v28 = vld [vmem:[#allocation10 + $0x74] ss:$8 sps:$4 sm:$0xff]   ;;  %v705_v29 = vld [vmem:[#allocation10 + $0x64] ss:$8 sps:$4 sm:$0xff]  }
  0x45   :  { %634 = vmatprep.subr.bf16.mxu1 %v861_v0  ;;  %651 = vmatpush3.bf16.msra.mxu0 %v692_v11  ;;  %v703_v30 = vld [vmem:[#allocation10 + $0x60] ss:$8 sps:$4 sm:$0xff]   ;;  %v708_v31 = vld [vmem:[#allocation10 + $0x54] ss:$8 sps:$4 sm:$0xff]   ;;  %v706_v32 = vld [vmem:[#allocation10 + $0x50] ss:$8 sps:$4 sm:$0xff]  }
  0x46   :  { %652 = vmatprep.subr.bf16.mxu0 %v861_v0  ;;  %v711_v33 = vld [vmem:[#allocation10 + $0x44] ss:$8 sps:$4 sm:$0xff]   ;;  %v709_v34 = vld [vmem:[#allocation10 + $0x40] ss:$8 sps:$4 sm:$0xff]   ;;  %v714_v35 = vld [vmem:[#allocation10 + $0x34] ss:$8 sps:$4 sm:$0xff]  }
  0x47   :  { %v712_v36 = vld [vmem:[#allocation10 + $0x30] ss:$8 sps:$4 sm:$0xff]   ;;  %v717_v37 = vld [vmem:[#allocation10 + $0x24] ss:$8 sps:$4 sm:$0xff]   ;;  %v715_v38 = vld [vmem:[#allocation10 + $0x20] ss:$8 sps:$4 sm:$0xff]  }
  0x48   :  { %635 = vmatpush3.bf16.msra.mxu1 %v686_v5  ;;  %v720_v39 = vld [vmem:[#allocation10 + $0x14] ss:$8 sps:$4 sm:$0xff]   ;;  %v718_v40 = vld [vmem:[#allocation10 + $0x10] ss:$8 sps:$4 sm:$0xff]   ;;  %v723_v49 = vld [vmem:[#allocation10 + $0x4] ss:$8 sps:$4 sm:$0xff]  }
  0x49   :  { %636 = vmatprep.subr.bf16.mxu1 %v861_v0  ;;  %653 = vmatpush3.bf16.msra.mxu0 %v693_v12  ;;  %v570_v41 = vld [vmem:[%s978_s4] ss:$0 sm:$0xff]  ;;  %v721_v50 = vld [vmem:[#allocation10] ss:$8 sps:$4 sm:$0xff]  }
  0x4a   :  { %654 = vmatprep.subr.bf16.mxu0 %v861_v0  ;;  %v579_v52 = vld [vmem:[%s980_s6] ss:$0 sm:$0xff]  ;;  %s864_s6 = smov [#allocation11]  }
  0x4b   :  { %v404_v63 = vld [vmem:[%s982_s8] sm:$0x3]  ;;  %s556_s18 = sshll.u32 %s864_s6, 4  ;;  %s557_s18 = int_to_ptr.vmem [resolvable:$true] %s556_s18 }
  0x4c   :  { %637 = vmatpush3.bf16.msra.mxu1 %v687_v6  ;;  %v409_v1 = vrot.slane %v404_v63, %v408_v62  ;;  %s824_s19 = scalar_lea.vmem %s557_s18, 256  ;;  %p829_p12 = scmp.lt.s32.totalorder %s557_s18, %s557_s18 }
  0x4d   :  { %638 = vmatprep.subr.bf16.mxu1 %v861_v0  ;;  %655 = vmatpush3.bf16.msra.mxu0 %v694_v13  ;;  %p825_p11 = scmp.ne.s32.totalorder %s557_s18, %s824_s19  ;;  %p830_p13 = scmp.lt.s32.totalorder %s824_s19, %s824_s19 }
  0x4e   :  { %656 = vmatprep.subr.bf16.mxu0 %v861_v0 }
  0x4f   :  { %p831_p0 = por %p830_p13, %p829_p12 }
  0x50   :  { %639 = vmatpush3.bf16.msra.mxu1 %v688_v7 }
  0x51   :  { %640 = vmatprep.subr.bf16.mxu1 %v861_v0  ;;  %657 = vmatpush3.bf16.msra.mxu0 %v695_v14  ;;  %p832_p1 = pnand %p831_p0, %p825_p11 }
  0x52   :  { %658 = vmatprep.subr.bf16.mxu0 %v861_v0 }
  0x54   :  { %641 = vmatpush3.bf16.msra.mxu1 %v689_v8 }
  0x55   :  { %642 = vmatprep.subr.bf16.mxu1 %v861_v0  ;;  %659 = vmatpush3.bf16.msra.mxu0 %v696_v15 }
  0x56   :  { %660 = vmatprep.subr.bf16.mxu0 %v861_v0 }
  0x58   :  { %643 = vmatpush3.bf16.msra.mxu1 %v690_v9 }
  0x59   :  { %644 = vmatprep.subr.bf16.mxu1 %v861_v0  ;;  %661 = vmatpush3.bf16.msra.mxu0 %v697_v16 }
  0x5a   :  { %662 = vmatprep.subr.bf16.mxu0 %v861_v0 }
  0x5c   :  { %645 = vmatpush3.bf16.msra.mxu1 %v691_v10 }
  0x5d   :  { %663 = vmatpush3.bf16.msra.mxu0 %v698_v25  ;;  %496 = vmatprep.subr.bf16.mxu1 %v702_v28 }
  0x5e   :  { %664 = vmatprep.subr.bf16.mxu0 %v861_v0  ;;  %v412_v0 = vsub.s32 1, %v407_v61 }
  0x60   :  { %v413_v2 = vrot.slane %v404_v63, %v412_v0 }
  0x61   :  { %665 = vmatpush3.bf16.msra.mxu0 %v699_v26 }
 0x103   :  { %v154_v18 = vpop.f32.mrf.mxu0 }
 0x104   :  { %v155_v19 = vadd.f32 %v567_v17, %v154_v18 }
 0x105   :  { %v628_v20 = vpop.f32.mrf.mxu0 }
 0x106   :  { %v160_v21 = vmax.f32 %v155_v19, 0.0 }
 0x107   :  { %v157_v22 = vpop.f32.mrf.mxu0 }
 0x108   :  { %v161_v23 = vpack.c.bf16 %v160_v21, %v160_v21 }
 0x109   :  { %v629_v24 = vpop.f32.mrf.mxu0 }
 0x10a   :  { %647 = vmatmul.mubr.bf16.vlgmr.msra.gmra.mxu1 %v161_v23 }
 0x10b   :  { %497 = vmatpush1.bf16.msra.mxu1 %v700_v27  ;;  %528 = vmatprep.mubr.bf16.mxu1 %v863_v51 }
 0x10c   :  { %498 = vmatprep.subr.bf16.mxu1 %v705_v29 }
 0x10f   :  { %499 = vmatpush1.bf16.msra.mxu1 %v703_v30 }
 0x110   :  { %500 = vmatprep.subr.bf16.mxu1 %v708_v31 }
 0x113   :  { %501 = vmatpush1.bf16.msra.mxu1 %v706_v32 }
 0x114   :  { %502 = vmatprep.subr.bf16.mxu1 %v711_v33 }
 0x117   :  { %503 = vmatpush1.bf16.msra.mxu1 %v709_v34 }
 0x118   :  { %504 = vmatprep.subr.bf16.mxu1 %v714_v35 }
 0x11b   :  { %505 = vmatpush1.bf16.msra.mxu1 %v712_v36 }
 0x11c   :  { %506 = vmatprep.subr.bf16.mxu1 %v717_v37 }
 0x11f   :  { %507 = vmatpush1.bf16.msra.mxu1 %v715_v38 }
 0x120   :  { %508 = vmatprep.subr.bf16.mxu1 %v720_v39 }
 0x123   :  { %509 = vmatpush1.bf16.msra.mxu1 %v718_v40 }
 0x124   :  { %510 = vmatprep.subr.bf16.mxu1 %v723_v49 }
 0x127   :  { %511 = vmatpush1.bf16.msra.mxu1 %v721_v50 }
 0x1ca   :  { %v267_v42 = vpop.f32.mrf.mxu1 }
 0x1cb   :  { %v268_v43 = vadd.f32 %v570_v41, %v267_v42 }
 0x1cc   :  { %v648_v44 = vpop.f32.mrf.mxu1 }
 0x1cd   :  { %v273_v45 = vmax.f32 %v268_v43, 0.0 }
 0x1ce   :  { %v270_v46 = vpop.f32.mrf.mxu1 }
 0x1cf   :  { %v274_v47 = vpack.c.bf16 %v273_v45, %v273_v45 }
 0x1d0   :  { %v649_v48 = vpop.f32.mrf.mxu1 }
 0x1d1   :  { %667 = vmatmul.mubr.bf16.vlgmr.msra.gmra.mxu0 %v274_v47 }
 0x291   :  { %v380_v53 = vpop.f32.mrf.mxu0 }
 0x292   :  { %v381_v54 = vadd.f32 %v579_v52, %v380_v53 }
 0x293   :  { %v668_v55 = vpop.f32.mrf.mxu0 }
 0x294   :  { %v386_v56 = vmax.f32 %v381_v54, 0.0 }
 0x295   :  { %v383_v57 = vpop.f32.mrf.mxu0 }
 0x296   :  { %v387_v58 = vpack.c.bf16 %v386_v56, %v386_v56 }
 0x297   :  { %v669_v59 = vpop.f32.mrf.mxu0 }
 0x298   :  { %529 = vmatmul.mubr.bf16.vlgmr.msra.gmra.mxu1 %v387_v58 }
 0x358   :  { %v530_v3 = vpop.f32.mrf.mxu1 }
 0x359   :  { %v531_v4 = vadd.f32 %v530_v3, %v409_v1 }
 0x35a   :  { %v532_v5 = vpop.f32.mrf.mxu1 }
 0x35b   :  { %548 = vst [vmem:[#allocation11] sm:$0xff] %v531_v4  ;;  %v533_v6 = vadd.f32 %v532_v5, %v413_v2 }
 0x35c   :  { %v534_v7 = vpop.f32.mrf.mxu1 }
 0x35d   :  { %v541_v8 = vmax.f32 %v533_v6, -20.0 }
 0x35e   :  { %v535_v9 = vpop.f32.mrf.mxu1 }
 0x35f   :  { %v543_v10 = vmin.f32 %v541_v8, 2.0 }
 0x361   :  { %549 = vst [vmem:[#allocation11 + $0x8] sm:$0xff] %v543_v10 }
 0x362   :  { %835 = shalt.err (!%p832_p1)
}
 0x363   :  { %559 = dma.vmem_to_hbm [thread:$0]  %s557_s18, 256, %s983_s9, [#allocation4]  }
 0x364   :  { %850 = dma.done.wait [#allocation4], 256  }
 0x365   :  { %851 = vsyncadd [#allocation4], 4294967040 }
 0x366   :  { %563 = vsyncpa [#allocation3], 1 }
 0x367   :  { %564 = vsyncpa [#allocation6], 1 }
 0x368   :  { %565 = vsyncpa [#allocation9], 1 }
 0x369   :  { %566 = vsyncpa [#allocation4], 1 }

</bundles_post_ra>
